<compile_context>
chip_gen: v7x
topology: tpu7x:2x2x1
jax: 0.10.0
libtpu: 0.0.40
codegen_flags: <defaults>
</compile_context>

<pallas_src>
import functools

import jax
import jax.numpy as jnp
from jax import lax
from jax.experimental import pallas as pl
from jax.experimental.pallas import tpu as pltpu


def _lstm_kernel(x_ref, wih_ref, whh_ref, b_ref, h0_ref, c0_ref,
                 hs_ref, xw_scr, *, seq_len, hidden_size):
    """Whole sequence in one invocation; recurrence is an unrolled fori_loop."""
    H = hidden_size

    # Batched input projection for all time steps: (T, I) @ (I, 4H) + b.
    xw_scr[...] = (
        jnp.dot(x_ref[...], wih_ref[...], preferred_element_type=jnp.float32)
        + b_ref[...])

    w_hh = whh_ref[...]            # (H, 4H), held in vregs across the loop

    def step(t, carry):
        h, c = carry                                              # (1, H) each
        gates = xw_scr[pl.ds(t, 1), :] + jnp.dot(
            h, w_hh, preferred_element_type=jnp.float32)          # (1, 4H)
        i_g = jax.nn.sigmoid(gates[:, 0 * H:1 * H])
        f_g = jax.nn.sigmoid(gates[:, 1 * H:2 * H])
        g_g = jnp.tanh(gates[:, 2 * H:3 * H])
        o_g = jax.nn.sigmoid(gates[:, 3 * H:4 * H])
        c_new = f_g * c + i_g * g_g
        h_new = o_g * jnp.tanh(c_new)
        hs_ref[pl.ds(t, 1), :] = h_new
        return (h_new, c_new)

    lax.fori_loop(0, seq_len, step, (h0_ref[...], c0_ref[...]), unroll=True)


def lstm_pred_forward(seq, params):
    """seq: (T, input_size) float32.  Returns (T, output_size)."""
    T, _ = seq.shape
    H = params["w_hh_t"].shape[0]

    kernel = functools.partial(_lstm_kernel, seq_len=T, hidden_size=H)
    vmem = pl.BlockSpec(memory_space=pltpu.MemorySpace.VMEM)

    hs = pl.pallas_call(
        kernel,
        out_shape=jax.ShapeDtypeStruct((T, H), jnp.float32),
        in_specs=[vmem] * 6,
        out_specs=vmem,
        scratch_shapes=[pltpu.VMEM((T, 4 * H), jnp.float32)],   # x @ W_ih^T + b
    )(seq, params["w_ih_t"], params["w_hh_t"], params["b"],
      params["h0"], params["c0"])

    # hidden2out head (H -> O=1): a single tiny matmul in the wrapper keeps the
    # kernel's store path lane-dense and the degenerate N=1 matmul out of the
    # serial loop (per perf review).
    return hs @ params["w_out_t"] + params["b_out"]


def init_params(key, input_size, hidden_size, output_size=1):
    """Deterministic init mimicking PyTorch's uniform(-1/sqrt(H), 1/sqrt(H))."""
    ks = jax.random.split(key, 6)
    H, I, O = hidden_size, input_size, output_size
    s = 1.0 / jnp.sqrt(H)
    u = lambda k, shape: jax.random.uniform(k, shape, jnp.float32, -s, s)
    w_ih = u(ks[0], (4 * H, I))       # PyTorch weight_ih_l0
    w_hh = u(ks[1], (4 * H, H))       # PyTorch weight_hh_l0
    b_ih = u(ks[2], (4 * H,))
    b_hh = u(ks[3], (4 * H,))
    w_out = u(ks[4], (O, H))          # hidden2out.weight
    b_out = u(ks[5], (O,))
    return {
        "w_ih_t": w_ih.T,                         # (I, 4H)
        "w_hh_t": w_hh.T,                         # (H, 4H)
        "b": (b_ih + b_hh).reshape(1, 4 * H),     # (1, 4H)
        "w_out_t": w_out.T,                       # (H, O)
        "b_out": b_out.reshape(1, O),             # (1, O)
        "h0": jnp.zeros((1, H), jnp.float32),     # init_hidden()
        "c0": jnp.zeros((1, H), jnp.float32),
    }


def reference_forward(seq, params):
    """Pure-JAX reference (PyTorch nn.LSTM semantics, batch=1)."""
    def step(carry, x_t):
        h, c = carry
        gates = x_t @ params["w_ih_t"] + h @ params["w_hh_t"] + params["b"]
        H = h.shape[-1]
        i = jax.nn.sigmoid(gates[:, 0 * H:1 * H])
        f = jax.nn.sigmoid(gates[:, 1 * H:2 * H])
        g = jnp.tanh(gates[:, 2 * H:3 * H])
        o = jax.nn.sigmoid(gates[:, 3 * H:4 * H])
        c = f * c + i * g
        h = o * jnp.tanh(c)
        return (h, c), h

    (_, _), hs = lax.scan(step, (params["h0"], params["c0"]), seq[:, None, :])
    hs = hs.reshape(seq.shape[0], -1)
    return hs @ params["w_out_t"] + params["b_out"]


if __name__ == "__main__":
    T, INPUT_SIZE, HIDDEN_SIZE, OUTPUT_SIZE = 8, 16, 32, 1

    key = jax.random.PRNGKey(0)
    k_seq, k_par = jax.random.split(key)
    seq = jax.random.normal(k_seq, (T, INPUT_SIZE), jnp.float32)
    params = init_params(k_par, INPUT_SIZE, HIDDEN_SIZE, OUTPUT_SIZE)

    out = jax.block_until_ready(lstm_pred_forward(seq, params))

    ref = reference_forward(seq, params)
    assert out.shape == (T, OUTPUT_SIZE), out.shape
    assert jnp.allclose(out, ref, atol=1e-4, rtol=1e-4), (
        float(jnp.max(jnp.abs(out - ref))))

    print("KERNEL_OK")
</pallas_src>

<mosaic_0001>
module attributes {stable_mosaic.version = 11 : i64} {
  func.func @_lstm_kernel(%arg0: memref<8x16xf32, #tpu.memory_space<vmem>>, %arg1: memref<16x128xf32, #tpu.memory_space<vmem>>, %arg2: memref<32x128xf32, #tpu.memory_space<vmem>>, %arg3: memref<1x128xf32, #tpu.memory_space<vmem>>, %arg4: memref<1x32xf32, #tpu.memory_space<vmem>>, %arg5: memref<1x32xf32, #tpu.memory_space<vmem>>, %arg6: memref<8x32xf32, #tpu.memory_space<vmem>>, %arg7: memref<8x128xf32, #tpu.memory_space<vmem>>) attributes {dimension_semantics = [], scalar_prefetch = 0 : i64, scratch_operands = 1 : i64, tpu.core_type = #tpu.core_type<tc>} {
    %c0 = arith.constant 0 : index
    %c0_0 = arith.constant 0 : index
    %0 = vector.load %arg0[%c0, %c0_0] : memref<8x16xf32, #tpu.memory_space<vmem>>, vector<8x16xf32>
    %c0_1 = arith.constant 0 : index
    %c0_2 = arith.constant 0 : index
    %1 = vector.load %arg1[%c0_1, %c0_2] : memref<16x128xf32, #tpu.memory_space<vmem>>, vector<16x128xf32>
    %cst = arith.constant dense<0.000000e+00> : vector<8x128xf32>
    %2 = tpu.matmul %0, %1, %cst {dimension_numbers = #tpu.dot_dimension_numbers<[1], [0], [0], [1], [0, 0, 1, 1], [], []>} : vector<8x16xf32>, vector<16x128xf32>, vector<8x128xf32> -> vector<8x128xf32>
    %c0_3 = arith.constant 0 : index
    %c0_4 = arith.constant 0 : index
    %3 = vector.load %arg3[%c0_3, %c0_4] : memref<1x128xf32, #tpu.memory_space<vmem>>, vector<1x128xf32>
    %4 = vector.broadcast %3 : vector<1x128xf32> to vector<8x128xf32>
    %5 = arith.addf %2, %4 : vector<8x128xf32>
    %c0_5 = arith.constant 0 : index
    %c0_6 = arith.constant 0 : index
    %6 = vector.load %arg7[%c0_5, %c0_6] : memref<8x128xf32, #tpu.memory_space<vmem>>, vector<8x128xf32>
    tpu.vector_store %arg7[%c0_5, %c0_6], %5 {strides = array<i32>} : memref<8x128xf32, #tpu.memory_space<vmem>>, vector<8x128xf32>,
    %c0_7 = arith.constant 0 : index
    %c0_8 = arith.constant 0 : index
    %7 = vector.load %arg2[%c0_7, %c0_8] : memref<32x128xf32, #tpu.memory_space<vmem>>, vector<32x128xf32>
    %c0_9 = arith.constant 0 : index
    %c0_10 = arith.constant 0 : index
    %8 = vector.load %arg4[%c0_9, %c0_10] : memref<1x32xf32, #tpu.memory_space<vmem>>, vector<1x32xf32>
    %c0_11 = arith.constant 0 : index
    %c0_12 = arith.constant 0 : index
    %9 = vector.load %arg5[%c0_11, %c0_12] : memref<1x32xf32, #tpu.memory_space<vmem>>, vector<1x32xf32>
    %c0_i32 = arith.constant 0 : i32
    %10 = arith.index_cast %c0_i32 : i32 to index
    %c0_13 = arith.constant 0 : index
    %11 = vector.load %arg7[%10, %c0_13] : memref<8x128xf32, #tpu.memory_space<vmem>>, vector<1x128xf32>
    %cst_14 = arith.constant dense<0.000000e+00> : vector<1x128xf32>
    %12 = tpu.matmul %8, %7, %cst_14 {dimension_numbers = #tpu.dot_dimension_numbers<[1], [0], [0], [1], [0, 0, 1, 1], [], []>} : vector<1x32xf32>, vector<32x128xf32>, vector<1x128xf32> -> vector<1x128xf32>
    %13 = arith.addf %11, %12 : vector<1x128xf32>
    %14 = vector.extract_strided_slice %13 {offsets = [0, 0], sizes = [1, 32], strides = [1, 1]} : vector<1x128xf32> to vector<1x32xf32>
    %15 = arith.negf %14 : vector<1x32xf32>
    %16 = math.exp %15 : vector<1x32xf32>
    %cst_15 = arith.constant 1.000000e+00 : f32
    %17 = vector.broadcast %cst_15 : f32 to vector<1x32xf32>
    %18 = arith.addf %17, %16 : vector<1x32xf32>
    %19 = arith.divf %17, %18 : vector<1x32xf32>
    %20 = vector.extract_strided_slice %13 {offsets = [0, 32], sizes = [1, 32], strides = [1, 1]} : vector<1x128xf32> to vector<1x32xf32>
    %21 = arith.negf %20 : vector<1x32xf32>
    %22 = math.exp %21 : vector<1x32xf32>
    %cst_16 = arith.constant 1.000000e+00 : f32
    %23 = vector.broadcast %cst_16 : f32 to vector<1x32xf32>
    %24 = arith.addf %23, %22 : vector<1x32xf32>
    %25 = arith.divf %23, %24 : vector<1x32xf32>
    %26 = vector.extract_strided_slice %13 {offsets = [0, 64], sizes = [1, 32], strides = [1, 1]} : vector<1x128xf32> to vector<1x32xf32>
    %27 = math.tanh %26 : vector<1x32xf32>
    %28 = vector.extract_strided_slice %13 {offsets = [0, 96], sizes = [1, 32], strides = [1, 1]} : vector<1x128xf32> to vector<1x32xf32>
    %29 = arith.negf %28 : vector<1x32xf32>
    %30 = math.exp %29 : vector<1x32xf32>
    %cst_17 = arith.constant 1.000000e+00 : f32
    %31 = vector.broadcast %cst_17 : f32 to vector<1x32xf32>
    %32 = arith.addf %31, %30 : vector<1x32xf32>
    %33 = arith.divf %31, %32 : vector<1x32xf32>
    %34 = arith.mulf %25, %9 : vector<1x32xf32>
    %35 = arith.mulf %19, %27 : vector<1x32xf32>
    %36 = arith.addf %34, %35 : vector<1x32xf32>
    %37 = math.tanh %36 : vector<1x32xf32>
    %38 = arith.mulf %33, %37 : vector<1x32xf32>
    %39 = arith.index_cast %c0_i32 : i32 to index
    %c0_18 = arith.constant 0 : index
    %40 = vector.load %arg6[%39, %c0_18] : memref<8x32xf32, #tpu.memory_space<vmem>>, vector<1x32xf32>
    tpu.vector_store %arg6[%39, %c0_18], %38 {strides = array<i32>} : memref<8x32xf32, #tpu.memory_space<vmem>>, vector<1x32xf32>,
    %c1_i32 = arith.constant 1 : i32
    %41 = arith.index_cast %c1_i32 : i32 to index
    %c0_19 = arith.constant 0 : index
    %42 = vector.load %arg7[%41, %c0_19] : memref<8x128xf32, #tpu.memory_space<vmem>>, vector<1x128xf32>
    %cst_20 = arith.constant dense<0.000000e+00> : vector<1x128xf32>
    %43 = tpu.matmul %38, %7, %cst_20 {dimension_numbers = #tpu.dot_dimension_numbers<[1], [0], [0], [1], [0, 0, 1, 1], [], []>} : vector<1x32xf32>, vector<32x128xf32>, vector<1x128xf32> -> vector<1x128xf32>
    %44 = arith.addf %42, %43 : vector<1x128xf32>
    %45 = vector.extract_strided_slice %44 {offsets = [0, 0], sizes = [1, 32], strides = [1, 1]} : vector<1x128xf32> to vector<1x32xf32>
    %46 = arith.negf %45 : vector<1x32xf32>
    %47 = math.exp %46 : vector<1x32xf32>
    %cst_21 = arith.constant 1.000000e+00 : f32
    %48 = vector.broadcast %cst_21 : f32 to vector<1x32xf32>
    %49 = arith.addf %48, %47 : vector<1x32xf32>
    %50 = arith.divf %48, %49 : vector<1x32xf32>
    %51 = vector.extract_strided_slice %44 {offsets = [0, 32], sizes = [1, 32], strides = [1, 1]} : vector<1x128xf32> to vector<1x32xf32>
    %52 = arith.negf %51 : vector<1x32xf32>
    %53 = math.exp %52 : vector<1x32xf32>
    %cst_22 = arith.constant 1.000000e+00 : f32
    %54 = vector.broadcast %cst_22 : f32 to vector<1x32xf32>
    %55 = arith.addf %54, %53 : vector<1x32xf32>
    %56 = arith.divf %54, %55 : vector<1x32xf32>
    %57 = vector.extract_strided_slice %44 {offsets = [0, 64], sizes = [1, 32], strides = [1, 1]} : vector<1x128xf32> to vector<1x32xf32>
    %58 = math.tanh %57 : vector<1x32xf32>
    %59 = vector.extract_strided_slice %44 {offsets = [0, 96], sizes = [1, 32], strides = [1, 1]} : vector<1x128xf32> to vector<1x32xf32>
    %60 = arith.negf %59 : vector<1x32xf32>
    %61 = math.exp %60 : vector<1x32xf32>
    %cst_23 = arith.constant 1.000000e+00 : f32
    %62 = vector.broadcast %cst_23 : f32 to vector<1x32xf32>
    %63 = arith.addf %62, %61 : vector<1x32xf32>
    %64 = arith.divf %62, %63 : vector<1x32xf32>
    %65 = arith.mulf %56, %36 : vector<1x32xf32>
    %66 = arith.mulf %50, %58 : vector<1x32xf32>
    %67 = arith.addf %65, %66 : vector<1x32xf32>
    %68 = math.tanh %67 : vector<1x32xf32>
    %69 = arith.mulf %64, %68 : vector<1x32xf32>
    %70 = arith.index_cast %c1_i32 : i32 to index
    %c0_24 = arith.constant 0 : index
    %71 = vector.load %arg6[%70, %c0_24] : memref<8x32xf32, #tpu.memory_space<vmem>>, vector<1x32xf32>
    tpu.vector_store %arg6[%70, %c0_24], %69 {strides = array<i32>} : memref<8x32xf32, #tpu.memory_space<vmem>>, vector<1x32xf32>,
    %c2_i32 = arith.constant 2 : i32
    %72 = arith.index_cast %c2_i32 : i32 to index
    %c0_25 = arith.constant 0 : index
    %73 = vector.load %arg7[%72, %c0_25] : memref<8x128xf32, #tpu.memory_space<vmem>>, vector<1x128xf32>
    %cst_26 = arith.constant dense<0.000000e+00> : vector<1x128xf32>
    %74 = tpu.matmul %69, %7, %cst_26 {dimension_numbers = #tpu.dot_dimension_numbers<[1], [0], [0], [1], [0, 0, 1, 1], [], []>} : vector<1x32xf32>, vector<32x128xf32>, vector<1x128xf32> -> vector<1x128xf32>
    %75 = arith.addf %73, %74 : vector<1x128xf32>
    %76 = vector.extract_strided_slice %75 {offsets = [0, 0], sizes = [1, 32], strides = [1, 1]} : vector<1x128xf32> to vector<1x32xf32>
    %77 = arith.negf %76 : vector<1x32xf32>
    %78 = math.exp %77 : vector<1x32xf32>
    %cst_27 = arith.constant 1.000000e+00 : f32
    %79 = vector.broadcast %cst_27 : f32 to vector<1x32xf32>
    %80 = arith.addf %79, %78 : vector<1x32xf32>
    %81 = arith.divf %79, %80 : vector<1x32xf32>
    %82 = vector.extract_strided_slice %75 {offsets = [0, 32], sizes = [1, 32], strides = [1, 1]} : vector<1x128xf32> to vector<1x32xf32>
    %83 = arith.negf %82 : vector<1x32xf32>
    %84 = math.exp %83 : vector<1x32xf32>
    %cst_28 = arith.constant 1.000000e+00 : f32
    %85 = vector.broadcast %cst_28 : f32 to vector<1x32xf32>
    %86 = arith.addf %85, %84 : vector<1x32xf32>
    %87 = arith.divf %85, %86 : vector<1x32xf32>
    %88 = vector.extract_strided_slice %75 {offsets = [0, 64], sizes = [1, 32], strides = [1, 1]} : vector<1x128xf32> to vector<1x32xf32>
    %89 = math.tanh %88 : vector<1x32xf32>
    %90 = vector.extract_strided_slice %75 {offsets = [0, 96], sizes = [1, 32], strides = [1, 1]} : vector<1x128xf32> to vector<1x32xf32>
    %91 = arith.negf %90 : vector<1x32xf32>
    %92 = math.exp %91 : vector<1x32xf32>
    %cst_29 = arith.constant 1.000000e+00 : f32
    %93 = vector.broadcast %cst_29 : f32 to vector<1x32xf32>
    %94 = arith.addf %93, %92 : vector<1x32xf32>
    %95 = arith.divf %93, %94 : vector<1x32xf32>
    %96 = arith.mulf %87, %67 : vector<1x32xf32>
    %97 = arith.mulf %81, %89 : vector<1x32xf32>
    %98 = arith.addf %96, %97 : vector<1x32xf32>
    %99 = math.tanh %98 : vector<1x32xf32>
    %100 = arith.mulf %95, %99 : vector<1x32xf32>
    %101 = arith.index_cast %c2_i32 : i32 to index
    %c0_30 = arith.constant 0 : index
    %102 = vector.load %arg6[%101, %c0_30] : memref<8x32xf32, #tpu.memory_space<vmem>>, vector<1x32xf32>
    tpu.vector_store %arg6[%101, %c0_30], %100 {strides = array<i32>} : memref<8x32xf32, #tpu.memory_space<vmem>>, vector<1x32xf32>,
    %c3_i32 = arith.constant 3 : i32
    %103 = arith.index_cast %c3_i32 : i32 to index
    %c0_31 = arith.constant 0 : index
    %104 = vector.load %arg7[%103, %c0_31] : memref<8x128xf32, #tpu.memory_space<vmem>>, vector<1x128xf32>
    %cst_32 = arith.constant dense<0.000000e+00> : vector<1x128xf32>
    %105 = tpu.matmul %100, %7, %cst_32 {dimension_numbers = #tpu.dot_dimension_numbers<[1], [0], [0], [1], [0, 0, 1, 1], [], []>} : vector<1x32xf32>, vector<32x128xf32>, vector<1x128xf32> -> vector<1x128xf32>
    %106 = arith.addf %104, %105 : vector<1x128xf32>
    %107 = vector.extract_strided_slice %106 {offsets = [0, 0], sizes = [1, 32], strides = [1, 1]} : vector<1x128xf32> to vector<1x32xf32>
    %108 = arith.negf %107 : vector<1x32xf32>
    %109 = math.exp %108 : vector<1x32xf32>
    %cst_33 = arith.constant 1.000000e+00 : f32
    %110 = vector.broadcast %cst_33 : f32 to vector<1x32xf32>
    %111 = arith.addf %110, %109 : vector<1x32xf32>
    %112 = arith.divf %110, %111 : vector<1x32xf32>
    %113 = vector.extract_strided_slice %106 {offsets = [0, 32], sizes = [1, 32], strides = [1, 1]} : vector<1x128xf32> to vector<1x32xf32>
    %114 = arith.negf %113 : vector<1x32xf32>
    %115 = math.exp %114 : vector<1x32xf32>
    %cst_34 = arith.constant 1.000000e+00 : f32
    %116 = vector.broadcast %cst_34 : f32 to vector<1x32xf32>
    %117 = arith.addf %116, %115 : vector<1x32xf32>
    %118 = arith.divf %116, %117 : vector<1x32xf32>
    %119 = vector.extract_strided_slice %106 {offsets = [0, 64], sizes = [1, 32], strides = [1, 1]} : vector<1x128xf32> to vector<1x32xf32>
    %120 = math.tanh %119 : vector<1x32xf32>
    %121 = vector.extract_strided_slice %106 {offsets = [0, 96], sizes = [1, 32], strides = [1, 1]} : vector<1x128xf32> to vector<1x32xf32>
    %122 = arith.negf %121 : vector<1x32xf32>
    %123 = math.exp %122 : vector<1x32xf32>
    %cst_35 = arith.constant 1.000000e+00 : f32
    %124 = vector.broadcast %cst_35 : f32 to vector<1x32xf32>
    %125 = arith.addf %124, %123 : vector<1x32xf32>
    %126 = arith.divf %124, %125 : vector<1x32xf32>
    %127 = arith.mulf %118, %98 : vector<1x32xf32>
    %128 = arith.mulf %112, %120 : vector<1x32xf32>
    %129 = arith.addf %127, %128 : vector<1x32xf32>
    %130 = math.tanh %129 : vector<1x32xf32>
    %131 = arith.mulf %126, %130 : vector<1x32xf32>
    %132 = arith.index_cast %c3_i32 : i32 to index
    %c0_36 = arith.constant 0 : index
    %133 = vector.load %arg6[%132, %c0_36] : memref<8x32xf32, #tpu.memory_space<vmem>>, vector<1x32xf32>
    tpu.vector_store %arg6[%132, %c0_36], %131 {strides = array<i32>} : memref<8x32xf32, #tpu.memory_space<vmem>>, vector<1x32xf32>,
    %c4_i32 = arith.constant 4 : i32
    %134 = arith.index_cast %c4_i32 : i32 to index
    %c0_37 = arith.constant 0 : index
    %135 = vector.load %arg7[%134, %c0_37] : memref<8x128xf32, #tpu.memory_space<vmem>>, vector<1x128xf32>
    %cst_38 = arith.constant dense<0.000000e+00> : vector<1x128xf32>
    %136 = tpu.matmul %131, %7, %cst_38 {dimension_numbers = #tpu.dot_dimension_numbers<[1], [0], [0], [1], [0, 0, 1, 1], [], []>} : vector<1x32xf32>, vector<32x128xf32>, vector<1x128xf32> -> vector<1x128xf32>
    %137 = arith.addf %135, %136 : vector<1x128xf32>
    %138 = vector.extract_strided_slice %137 {offsets = [0, 0], sizes = [1, 32], strides = [1, 1]} : vector<1x128xf32> to vector<1x32xf32>
    %139 = arith.negf %138 : vector<1x32xf32>
    %140 = math.exp %139 : vector<1x32xf32>
    %cst_39 = arith.constant 1.000000e+00 : f32
    %141 = vector.broadcast %cst_39 : f32 to vector<1x32xf32>
    %142 = arith.addf %141, %140 : vector<1x32xf32>
    %143 = arith.divf %141, %142 : vector<1x32xf32>
    %144 = vector.extract_strided_slice %137 {offsets = [0, 32], sizes = [1, 32], strides = [1, 1]} : vector<1x128xf32> to vector<1x32xf32>
    %145 = arith.negf %144 : vector<1x32xf32>
    %146 = math.exp %145 : vector<1x32xf32>
    %cst_40 = arith.constant 1.000000e+00 : f32
    %147 = vector.broadcast %cst_40 : f32 to vector<1x32xf32>
    %148 = arith.addf %147, %146 : vector<1x32xf32>
    %149 = arith.divf %147, %148 : vector<1x32xf32>
    %150 = vector.extract_strided_slice %137 {offsets = [0, 64], sizes = [1, 32], strides = [1, 1]} : vector<1x128xf32> to vector<1x32xf32>
    %151 = math.tanh %150 : vector<1x32xf32>
    %152 = vector.extract_strided_slice %137 {offsets = [0, 96], sizes = [1, 32], strides = [1, 1]} : vector<1x128xf32> to vector<1x32xf32>
    %153 = arith.negf %152 : vector<1x32xf32>
    %154 = math.exp %153 : vector<1x32xf32>
    %cst_41 = arith.constant 1.000000e+00 : f32
    %155 = vector.broadcast %cst_41 : f32 to vector<1x32xf32>
    %156 = arith.addf %155, %154 : vector<1x32xf32>
    %157 = arith.divf %155, %156 : vector<1x32xf32>
    %158 = arith.mulf %149, %129 : vector<1x32xf32>
    %159 = arith.mulf %143, %151 : vector<1x32xf32>
    %160 = arith.addf %158, %159 : vector<1x32xf32>
    %161 = math.tanh %160 : vector<1x32xf32>
    %162 = arith.mulf %157, %161 : vector<1x32xf32>
    %163 = arith.index_cast %c4_i32 : i32 to index
    %c0_42 = arith.constant 0 : index
    %164 = vector.load %arg6[%163, %c0_42] : memref<8x32xf32, #tpu.memory_space<vmem>>, vector<1x32xf32>
    tpu.vector_store %arg6[%163, %c0_42], %162 {strides = array<i32>} : memref<8x32xf32, #tpu.memory_space<vmem>>, vector<1x32xf32>,
    %c5_i32 = arith.constant 5 : i32
    %165 = arith.index_cast %c5_i32 : i32 to index
    %c0_43 = arith.constant 0 : index
    %166 = vector.load %arg7[%165, %c0_43] : memref<8x128xf32, #tpu.memory_space<vmem>>, vector<1x128xf32>
    %cst_44 = arith.constant dense<0.000000e+00> : vector<1x128xf32>
    %167 = tpu.matmul %162, %7, %cst_44 {dimension_numbers = #tpu.dot_dimension_numbers<[1], [0], [0], [1], [0, 0, 1, 1], [], []>} : vector<1x32xf32>, vector<32x128xf32>, vector<1x128xf32> -> vector<1x128xf32>
    %168 = arith.addf %166, %167 : vector<1x128xf32>
    %169 = vector.extract_strided_slice %168 {offsets = [0, 0], sizes = [1, 32], strides = [1, 1]} : vector<1x128xf32> to vector<1x32xf32>
    %170 = arith.negf %169 : vector<1x32xf32>
    %171 = math.exp %170 : vector<1x32xf32>
    %cst_45 = arith.constant 1.000000e+00 : f32
    %172 = vector.broadcast %cst_45 : f32 to vector<1x32xf32>
    %173 = arith.addf %172, %171 : vector<1x32xf32>
    %174 = arith.divf %172, %173 : vector<1x32xf32>
    %175 = vector.extract_strided_slice %168 {offsets = [0, 32], sizes = [1, 32], strides = [1, 1]} : vector<1x128xf32> to vector<1x32xf32>
    %176 = arith.negf %175 : vector<1x32xf32>
    %177 = math.exp %176 : vector<1x32xf32>
    %cst_46 = arith.constant 1.000000e+00 : f32
    %178 = vector.broadcast %cst_46 : f32 to vector<1x32xf32>
    %179 = arith.addf %178, %177 : vector<1x32xf32>
    %180 = arith.divf %178, %179 : vector<1x32xf32>
    %181 = vector.extract_strided_slice %168 {offsets = [0, 64], sizes = [1, 32], strides = [1, 1]} : vector<1x128xf32> to vector<1x32xf32>
    %182 = math.tanh %181 : vector<1x32xf32>
    %183 = vector.extract_strided_slice %168 {offsets = [0, 96], sizes = [1, 32], strides = [1, 1]} : vector<1x128xf32> to vector<1x32xf32>
    %184 = arith.negf %183 : vector<1x32xf32>
    %185 = math.exp %184 : vector<1x32xf32>
    %cst_47 = arith.constant 1.000000e+00 : f32
    %186 = vector.broadcast %cst_47 : f32 to vector<1x32xf32>
    %187 = arith.addf %186, %185 : vector<1x32xf32>
    %188 = arith.divf %186, %187 : vector<1x32xf32>
    %189 = arith.mulf %180, %160 : vector<1x32xf32>
    %190 = arith.mulf %174, %182 : vector<1x32xf32>
    %191 = arith.addf %189, %190 : vector<1x32xf32>
    %192 = math.tanh %191 : vector<1x32xf32>
    %193 = arith.mulf %188, %192 : vector<1x32xf32>
    %194 = arith.index_cast %c5_i32 : i32 to index
    %c0_48 = arith.constant 0 : index
    %195 = vector.load %arg6[%194, %c0_48] : memref<8x32xf32, #tpu.memory_space<vmem>>, vector<1x32xf32>
    tpu.vector_store %arg6[%194, %c0_48], %193 {strides = array<i32>} : memref<8x32xf32, #tpu.memory_space<vmem>>, vector<1x32xf32>,
    %c6_i32 = arith.constant 6 : i32
    %196 = arith.index_cast %c6_i32 : i32 to index
    %c0_49 = arith.constant 0 : index
    %197 = vector.load %arg7[%196, %c0_49] : memref<8x128xf32, #tpu.memory_space<vmem>>, vector<1x128xf32>
    %cst_50 = arith.constant dense<0.000000e+00> : vector<1x128xf32>
    %198 = tpu.matmul %193, %7, %cst_50 {dimension_numbers = #tpu.dot_dimension_numbers<[1], [0], [0], [1], [0, 0, 1, 1], [], []>} : vector<1x32xf32>, vector<32x128xf32>, vector<1x128xf32> -> vector<1x128xf32>
    %199 = arith.addf %197, %198 : vector<1x128xf32>
    %200 = vector.extract_strided_slice %199 {offsets = [0, 0], sizes = [1, 32], strides = [1, 1]} : vector<1x128xf32> to vector<1x32xf32>
    %201 = arith.negf %200 : vector<1x32xf32>
    %202 = math.exp %201 : vector<1x32xf32>
    %cst_51 = arith.constant 1.000000e+00 : f32
    %203 = vector.broadcast %cst_51 : f32 to vector<1x32xf32>
    %204 = arith.addf %203, %202 : vector<1x32xf32>
    %205 = arith.divf %203, %204 : vector<1x32xf32>
    %206 = vector.extract_strided_slice %199 {offsets = [0, 32], sizes = [1, 32], strides = [1, 1]} : vector<1x128xf32> to vector<1x32xf32>
    %207 = arith.negf %206 : vector<1x32xf32>
    %208 = math.exp %207 : vector<1x32xf32>
    %cst_52 = arith.constant 1.000000e+00 : f32
    %209 = vector.broadcast %cst_52 : f32 to vector<1x32xf32>
    %210 = arith.addf %209, %208 : vector<1x32xf32>
    %211 = arith.divf %209, %210 : vector<1x32xf32>
    %212 = vector.extract_strided_slice %199 {offsets = [0, 64], sizes = [1, 32], strides = [1, 1]} : vector<1x128xf32> to vector<1x32xf32>
    %213 = math.tanh %212 : vector<1x32xf32>
    %214 = vector.extract_strided_slice %199 {offsets = [0, 96], sizes = [1, 32], strides = [1, 1]} : vector<1x128xf32> to vector<1x32xf32>
    %215 = arith.negf %214 : vector<1x32xf32>
    %216 = math.exp %215 : vector<1x32xf32>
    %cst_53 = arith.constant 1.000000e+00 : f32
    %217 = vector.broadcast %cst_53 : f32 to vector<1x32xf32>
    %218 = arith.addf %217, %216 : vector<1x32xf32>
    %219 = arith.divf %217, %218 : vector<1x32xf32>
    %220 = arith.mulf %211, %191 : vector<1x32xf32>
    %221 = arith.mulf %205, %213 : vector<1x32xf32>
    %222 = arith.addf %220, %221 : vector<1x32xf32>
    %223 = math.tanh %222 : vector<1x32xf32>
    %224 = arith.mulf %219, %223 : vector<1x32xf32>
    %225 = arith.index_cast %c6_i32 : i32 to index
    %c0_54 = arith.constant 0 : index
    %226 = vector.load %arg6[%225, %c0_54] : memref<8x32xf32, #tpu.memory_space<vmem>>, vector<1x32xf32>
    tpu.vector_store %arg6[%225, %c0_54], %224 {strides = array<i32>} : memref<8x32xf32, #tpu.memory_space<vmem>>, vector<1x32xf32>,
    %c7_i32 = arith.constant 7 : i32
    %227 = arith.index_cast %c7_i32 : i32 to index
    %c0_55 = arith.constant 0 : index
    %228 = vector.load %arg7[%227, %c0_55] : memref<8x128xf32, #tpu.memory_space<vmem>>, vector<1x128xf32>
    %cst_56 = arith.constant dense<0.000000e+00> : vector<1x128xf32>
    %229 = tpu.matmul %224, %7, %cst_56 {dimension_numbers = #tpu.dot_dimension_numbers<[1], [0], [0], [1], [0, 0, 1, 1], [], []>} : vector<1x32xf32>, vector<32x128xf32>, vector<1x128xf32> -> vector<1x128xf32>
    %230 = arith.addf %228, %229 : vector<1x128xf32>
    %231 = vector.extract_strided_slice %230 {offsets = [0, 0], sizes = [1, 32], strides = [1, 1]} : vector<1x128xf32> to vector<1x32xf32>
    %232 = arith.negf %231 : vector<1x32xf32>
    %233 = math.exp %232 : vector<1x32xf32>
    %cst_57 = arith.constant 1.000000e+00 : f32
    %234 = vector.broadcast %cst_57 : f32 to vector<1x32xf32>
    %235 = arith.addf %234, %233 : vector<1x32xf32>
    %236 = arith.divf %234, %235 : vector<1x32xf32>
    %237 = vector.extract_strided_slice %230 {offsets = [0, 32], sizes = [1, 32], strides = [1, 1]} : vector<1x128xf32> to vector<1x32xf32>
    %238 = arith.negf %237 : vector<1x32xf32>
    %239 = math.exp %238 : vector<1x32xf32>
    %cst_58 = arith.constant 1.000000e+00 : f32
    %240 = vector.broadcast %cst_58 : f32 to vector<1x32xf32>
    %241 = arith.addf %240, %239 : vector<1x32xf32>
    %242 = arith.divf %240, %241 : vector<1x32xf32>
    %243 = vector.extract_strided_slice %230 {offsets = [0, 64], sizes = [1, 32], strides = [1, 1]} : vector<1x128xf32> to vector<1x32xf32>
    %244 = math.tanh %243 : vector<1x32xf32>
    %245 = vector.extract_strided_slice %230 {offsets = [0, 96], sizes = [1, 32], strides = [1, 1]} : vector<1x128xf32> to vector<1x32xf32>
    %246 = arith.negf %245 : vector<1x32xf32>
    %247 = math.exp %246 : vector<1x32xf32>
    %cst_59 = arith.constant 1.000000e+00 : f32
    %248 = vector.broadcast %cst_59 : f32 to vector<1x32xf32>
    %249 = arith.addf %248, %247 : vector<1x32xf32>
    %250 = arith.divf %248, %249 : vector<1x32xf32>
    %251 = arith.mulf %242, %222 : vector<1x32xf32>
    %252 = arith.mulf %236, %244 : vector<1x32xf32>
    %253 = arith.addf %251, %252 : vector<1x32xf32>
    %254 = math.tanh %253 : vector<1x32xf32>
    %255 = arith.mulf %250, %254 : vector<1x32xf32>
    %256 = arith.index_cast %c7_i32 : i32 to index
    %c0_60 = arith.constant 0 : index
    %257 = vector.load %arg6[%256, %c0_60] : memref<8x32xf32, #tpu.memory_space<vmem>>, vector<1x32xf32>
    tpu.vector_store %arg6[%256, %c0_60], %255 {strides = array<i32>} : memref<8x32xf32, #tpu.memory_space<vmem>>, vector<1x32xf32>,
    %c8_i32 = arith.constant 8 : i32
    return
  }
}

</mosaic_0001>

<bundles_post_ra>
// kernel: tpu_custom_call.1
= control target key start
LH: loop header
LB: loop body
LE: loop exit
PB: predicated region body
PF: predicated region fallthrough
CT: control target
= control target key end

     0   :  { %11 = vsyncpa [#allocation4], 0  ;;  %s1595_s0 = inlined_call_operand.hbm [shape: f32[8,16], index: 0, kind: input, shape index: {}]   ;;  %s1596_s1 = inlined_call_operand.hbm [shape: f32[16,128], index: 1, kind: input, shape index: {}]   ;;  %s1597_s2 = inlined_call_operand.hbm [shape: f32[32,128], index: 2, kind: input, shape index: {}]   ;;  %s1598_s3 = inlined_call_operand.vmem [shape: f32[1,128], index: 3, kind: input, shape index: {}]   ;;  %s1599_s4 = inlined_call_operand.vmem [shape: f32[1,32], index: 4, kind: input, shape index: {}]   ;;  %s1600_s5 = inlined_call_operand.vmem [shape: f32[1,32], index: 5, kind: input, shape index: {}]   ;;  %s1601_s6 = inlined_call_operand.hbm [shape: f32[8,32], index: 6, kind: output, shape index: {}]  }
   0x1   :  { %12 = vsyncpa [#allocation7], 0 }
   0x2   :  { %13 = vsyncpa [#allocation5], 0  ;;  %s1382_s21 = smov [#allocation6]   ;;  %s1288_s25 = scalar_lea.hbm %s1596_s1, 256 }
   0x3   :  { %s29_s22 = sshll.u32 %s1382_s21, 4  ;;  %p1289_p0 = scmp.ne.s32.totalorder %s1596_s1, %s1288_s25  ;;  %s30_s22 = int_to_ptr.vmem [resolvable:$true] %s29_s22 }
   0x4   :  { %p1292_p1 = scmp.lt.u32.totalorder %s1288_s25, %s1596_s1 }
   0x6   :  { %p1294_p2 = pnand %p1292_p1, %p1289_p0 }
   0x8   :  { %1297 = shalt.err (!%p1294_p2)
}
   0x9   :  { %s1298_s30 = scalar_lea.vmem %s30_s22, 256  ;;  %p1303_p4 = scmp.lt.s32.totalorder %s30_s22, %s30_s22 }
   0xa   :  { %p1299_p3 = scmp.ne.s32.totalorder %s30_s22, %s1298_s30  ;;  %p1304_p5 = scmp.lt.s32.totalorder %s1298_s30, %s1298_s30 }
   0xc   :  { %p1305_p6 = por %p1304_p5, %p1303_p4 }
   0xe   :  { %p1306_p7 = pnand %p1305_p6, %p1299_p3 }
  0x10   :  { %1309 = shalt.err (!%p1306_p7)
}
  0x11   :  { %s1383_s7 = smov 128   ;;  %s1384_s8 = smov 8  }
  0x12   :  { %35 = dma.hbm_to_vmem [thread:$0]  %s1596_s1, 256, %s30_s22, [#allocation7], %s1383_s7, %s1383_s7, %s1384_s8  }
  0x13   :  { %s1385_s11 = smov [#allocation3]   ;;  %s1386_s13 = smov [#allocation8]  }
  0x14   :  { %s20_s12 = sshll.u32 %s1385_s11, 4  ;;  %s41_s14 = sshll.u32 %s1386_s13, 4  ;;  %s21_s12 = int_to_ptr.vmem [resolvable:$true] %s20_s12  ;;  %s42_s14 = int_to_ptr.vmem [resolvable:$true] %s41_s14 }
  0x15   :  { %s1310_s17 = scalar_lea.hbm %s1595_s0, 128 }
  0x16   :  { %p1311_p8 = scmp.ne.s32.totalorder %s1595_s0, %s1310_s17  ;;  %p1314_p9 = scmp.lt.u32.totalorder %s1310_s17, %s1595_s0 }
  0x18   :  { %p1316_p10 = pnand %p1314_p9, %p1311_p8 }
  0x1a   :  { %1319 = shalt.err (!%p1316_p10)
}
  0x1b   :  { %s1320_s1 = scalar_lea.vmem %s21_s12, 128  ;;  %p1325_p12 = scmp.lt.s32.totalorder %s21_s12, %s21_s12 }
  0x1c   :  { %p1321_p11 = scmp.ne.s32.totalorder %s21_s12, %s1320_s1  ;;  %p1326_p13 = scmp.lt.s32.totalorder %s1320_s1, %s1320_s1 }
  0x1e   :  { %p1327_p0 = por %p1326_p13, %p1325_p12 }
  0x20   :  { %p1328_p1 = pnand %p1327_p0, %p1321_p11 }
  0x22   :  { %1331 = shalt.err (!%p1328_p1)
}
  0x23   :  { %23 = dma.hbm_to_vmem [thread:$0]  %s1595_s0, 128, %s21_s12, [#allocation4]  }
  0x24   :  { %s1332_s26 = scalar_lea.hbm %s1597_s2, 512 }
  0x25   :  { %p1333_p2 = scmp.ne.s32.totalorder %s1597_s2, %s1332_s26  ;;  %p1336_p3 = scmp.lt.u32.totalorder %s1332_s26, %s1597_s2 }
  0x27   :  { %p1338_p4 = pnand %p1336_p3, %p1333_p2 }
  0x29   :  { %1341 = shalt.err (!%p1338_p4)
}
  0x2a   :  { %s1342_s9 = scalar_lea.vmem %s42_s14, 512  ;;  %p1347_p6 = scmp.lt.s32.totalorder %s42_s14, %s42_s14 }
  0x2b   :  { %p1343_p5 = scmp.ne.s32.totalorder %s42_s14, %s1342_s9  ;;  %p1348_p7 = scmp.lt.s32.totalorder %s1342_s9, %s1342_s9 }
  0x2d   :  { %p1349_p8 = por %p1348_p7, %p1347_p6 }
  0x2f   :  { %p1350_p9 = pnand %p1349_p8, %p1343_p5 }
  0x31   :  { %1353 = shalt.err (!%p1350_p9)
}
  0x32   :  { %47 = dma.hbm_to_vmem [thread:$0]  %s1597_s2, 512, %s42_s14, [#allocation7], %s1383_s7, %s1383_s7, %s1384_s8  }
  0x33   :  { %1376 = dma.done.wait [#allocation4], 128  }
  0x34   :  { %1377 = vsyncadd [#allocation4], 4294967168 }
  0x35   :  { %1378 = dma.done.wait [#allocation7], 768  }
  0x36   :  { %1379 = vsyncadd [#allocation7], 4294966528  ;;  %v1387_v0 = vmov 0.0|0.0   ;;  %vm1388_vm0 = vmmov 0   ;;  %v1389_v1 = vmov 0.0   ;;  %v64_v2 = vld [vmem:[#allocation6] sm:$0xff] }
  0x37   :  { %1162 = vmatprep.subr.bf16.mxu0 %v1387_v0  ;;  %1071 = vmatprep.mubr.msk.f32.mxu0 %vm1388_vm0, %v1389_v1  ;;  %v65_v3 = vld [vmem:[#allocation6 + $0x8] sm:$0xff]  ;;  %v148_v5 = vld [vmem:[#allocation8] sm:$0xff]  ;;  %v149_v6 = vld [vmem:[#allocation8 + $0x8] sm:$0xff]  ;;  %vm73_vm1 = vcmask 130048   ;;  %vm155_vm2 = vcmask 261120   ;;  %s1390_s11 = smov 64  }
  0x38   :  { %1165 = vmatprep.subr.bf16.mxu1 %v1387_v0  ;;  %1082 = vmatprep.mubr.msk.f32.mxu1 %vm1388_vm0, %v1389_v1  ;;  %v1163_v4 = vpack.c.bf16 %v65_v3, %v64_v2  ;;  %v150_v7 = vld [vmem:[#allocation8 + $0x10] sm:$0xff]  ;;  %v1476_v8 = vpack.c.bf16 %v149_v6, %v148_v5  ;;  %v151_v9 = vld [vmem:[#allocation8 + $0x18] sm:$0xff]  ;;  %v63_v10 = vld [vmem:[#allocation3] sm:$0xff]  ;;  %s1391_s14 = smov 32   ;;  %vm266_vm3 = vcmask 253952  }
  0x39   :  { %v1479_v11 = vpack.c.bf16 %v151_v9, %v150_v7  ;;  %v152_v12 = vld [vmem:[%s1599_s4] sm:$0x1] }
  0x3a   :  { %1164 = vmatpush3.bf16.msra.mxu0 %v1163_v4  ;;  %1167 = vmatpush3.bf16.msra.mxu1 %v1476_v8  ;;  %v1005_v13 = vld [vmem:[%s1598_s3] ss:$0 sm:$0xff]  ;;  %s1392_s3 = smov [#allocation9]  }
  0x3b   :  { %1171 = vmatprep.subr.bf16.mxu0 %v1387_v0  ;;  %1168 = vmatprep.subr.bf16.mxu1 %v1387_v0  ;;  %v1009_v22 = vld [vmem:[%s1600_s5] ss:$0 sm:$0xff]  ;;  %s995_s5 = sshll.u32 %s1392_s3, 4  ;;  %s996_s5 = int_to_ptr.vmem [resolvable:$true] %s995_s5 }
  0x3c   :  { %s1354_s15 = scalar_lea.vmem %s996_s5, 128  ;;  %p1359_p11 = scmp.lt.s32.totalorder %s996_s5, %s996_s5 }
  0x3d   :  { %1072 = vmatmul.mubr.msk.f32.vlgmr.msra.gmra.mrb[0].mxu0 %vm73_vm1, %v63_v10  ;;  %p1355_p10 = scmp.ne.s32.totalorder %s996_s5, %s1354_s15  ;;  %p1360_p12 = scmp.lt.s32.totalorder %s1354_s15, %s1354_s15 }
  0x3e   :  { %1173 = vmatpush3.bf16.msra.mxu0 %v1476_v8  ;;  %1093 = vmatprep.mubr.msk.f32.mxu0 %vm1388_vm0, %v1389_v1 }
  0x3f   :  { %1170 = vmatpush3.bf16.msra.mxu1 %v1479_v11  ;;  %1174 = vmatprep.subr.bf16.mxu0 %v1387_v0  ;;  %p1361_p13 = por %p1360_p12, %p1359_p11 }
  0x40   :  { %1177 = vmatprep.subr.bf16.mxu1 %v1387_v0 }
  0x41   :  { %p1362_p0 = pnand %p1361_p13, %p1355_p10 }
  0x42   :  { %1083 = vmatmul.mubr.msk.f32.vlgmr.msra.gmra.mrb[0].mxu1 %vm155_vm2, %v152_v12  ;;  %1176 = vmatpush3.bf16.msra.mxu0 %v1479_v11 }
  0x43   :  { %1179 = vmatpush3.bf16.msra.mxu1 %v1476_v8  ;;  %1104 = vmatprep.mubr.msk.f32.mxu1 %vm1388_vm0, %v1389_v1 }
  0x44   :  { %1180 = vmatprep.subr.bf16.mxu1 %v1387_v0  ;;  %1183 = vmatprep.subr.bf16.mxu0 %v1387_v0 }
  0x47   :  { %1182 = vmatpush3.bf16.msra.mxu1 %v1479_v11 }
  0x48   :  { %1189 = vmatprep.subr.bf16.mxu1 %v1387_v0 }
 0x110   :  { %v143_v14 = vpop.f32.mrb[0].mxu0 }
 0x111   :  { %v144_v15 = vadd.f32 %v1005_v13, %v143_v14  ;;  %v1073_v16 = vpop.f32.mrb[1].mxu0 }
 0x113   :  { %147 = vst [vmem:[#allocation2] sm:$0xff] %v144_v15 }
 0x115   :  { %v225_v17 = vpop.f32.mrb[0].mxu1 }
 0x116   :  { %v1084_v18 = vpop.f32.mrb[1].mxu1 }
 0x11a   :  { %v154_v19 = vld [vmem:[#allocation2] sm:$0x1]  ;;  %v268_v37 = vld [vmem:[#allocation2 + $0x1] sm:$0x1]  ;;  %v371_v55 = vld [vmem:[#allocation2 + $0x2] sm:$0x1] }
 0x11b   :  { %v229_v20 = vadd.f32 %v225_v17, %v154_v19  ;;  %v474_v13 = vld [vmem:[#allocation2 + $0x3] sm:$0x1] }
 0x11d   :  { %1224 = vtanh.f32 %v229_v20  ;;  %v1008_v23 = vmul.f32 -1.442695, %v229_v20 }
 0x11f   :  { %1226 = vpow2.f32 %v1008_v23 }
 0x127   :  { %v1225_v21 = vpop.eup %1224 }
 0x128   :  { %247 = vrot.lane.b32.xlu0 %v1225_v21, %s1390_s11 }
 0x129   :  { %v1227_v24 = vpop.eup %1226 }
 0x12a   :  { %v233_v25 = vadd.f32 1.0, %v1227_v24 }
 0x12c   :  { %242 = vrot.lane.b32.xlu0 %v1009_v22, %s1391_s14  ;;  %1228 = vrcp.f32 %v233_v25 }
 0x136   :  { %v1229_v26 = vpop.eup %1228 }
 0x19a   :  { %v248_v27 = vpop.permute.xlu0 %247 }
 0x19b   :  { %v250_v28 = vmul.f32 %v1229_v26, %v248_v27 }
 0x19d   :  { %252 = vrot.lane.b32.xlu1 %v250_v28, %s1391_s14 }
 0x19e   :  { %v243_v29 = vpop.permute.xlu0 %242 }
 0x19f   :  { %v245_v30 = vmul.f32 %v1229_v26, %v243_v29 }
 0x20f   :  { %v253_v31 = vpop.permute.xlu1 %252 }
 0x210   :  { %v255_v32 = vadd.f32 %v253_v31, %v245_v30  ;;  %v577_v31 = vld [vmem:[#allocation2 + $0x4] sm:$0x1] }
 0x212   :  { %1230 = vtanh.f32 %v255_v32 }
 0x21c   :  { %v1231_v33 = vpop.eup %1230 }
 0x21d   :  { %258 = vrot.lane.b32.xlu1 %v1231_v33, %s1390_s11 }
 0x28f   :  { %v259_v34 = vpop.permute.xlu1 %258 }
 0x290   :  { %v261_v35 = vmul.f32 %v1229_v26, %v259_v34 }
 0x292   :  { %263 = vrot.lane.b32.xlu0 %v261_v35, %s1391_s14 }
 0x304   :  { %v264_v36 = vpop.permute.xlu0 %263 }
 0x305   :  { %267 = vst.msk [vmem:[#allocation9] sm:$0x1] %vm266_vm3, %v264_v36  ;;  %1094 = vmatmul.mubr.msk.f32.vlgmr.msra.gmra.mrb[2].mxu0 %vm155_vm2, %v264_v36 }
 0x306   :  { %1185 = vmatpush3.bf16.msra.mxu0 %v1476_v8  ;;  %1115 = vmatprep.mubr.msk.f32.mxu0 %vm1388_vm0, %v1389_v1 }
 0x307   :  { %1186 = vmatprep.subr.bf16.mxu0 %v1387_v0 }
 0x30a   :  { %1188 = vmatpush3.bf16.msra.mxu0 %v1479_v11 }
 0x30b   :  { %1195 = vmatprep.subr.bf16.mxu0 %v1387_v0 }
 0x3d8   :  { %v337_v38 = vpop.f32.mrb[2].mxu0 }
 0x3d9   :  { %v341_v39 = vadd.f32 %v337_v38, %v268_v37  ;;  %v1095_v40 = vpop.f32.mrb[3].mxu0 }
 0x3db   :  { %1232 = vtanh.f32 %v341_v39  ;;  %v1011_v42 = vmul.f32 -1.442695, %v341_v39 }
 0x3dd   :  { %1234 = vpow2.f32 %v1011_v42 }
 0x3e5   :  { %v1233_v41 = vpop.eup %1232 }
 0x3e6   :  { %351 = vrot.lane.b32.xlu1 %v1233_v41, %s1390_s11 }
 0x3e7   :  { %v1235_v43 = vpop.eup %1234 }
 0x3e8   :  { %v345_v44 = vadd.f32 1.0, %v1235_v43 }
 0x3ea   :  { %1236 = vrcp.f32 %v345_v44 }
 0x3f4   :  { %v1237_v45 = vpop.eup %1236 }
 0x3f5   :  { %v349_v48 = vmul.f32 %v1237_v45, %v255_v32 }
 0x458   :  { %v352_v46 = vpop.permute.xlu1 %351 }
 0x459   :  { %v354_v47 = vmul.f32 %v1237_v45, %v352_v46 }
 0x45b   :  { %356 = vrot.lane.b32.xlu0 %v354_v47, %s1391_s14 }
 0x4cd   :  { %v357_v49 = vpop.permute.xlu0 %356 }
 0x4ce   :  { %v359_v50 = vadd.f32 %v357_v49, %v349_v48  ;;  %v680_v49 = vld [vmem:[#allocation2 + $0x5] sm:$0x1] }
 0x4d0   :  { %1238 = vtanh.f32 %v359_v50 }
 0x4da   :  { %v1239_v51 = vpop.eup %1238 }
 0x4db   :  { %362 = vrot.lane.b32.xlu1 %v1239_v51, %s1390_s11 }
 0x54d   :  { %v363_v52 = vpop.permute.xlu1 %362 }
 0x54e   :  { %v365_v53 = vmul.f32 %v1237_v45, %v363_v52 }
 0x550   :  { %367 = vrot.lane.b32.xlu0 %v365_v53, %s1391_s14 }
 0x5c2   :  { %v368_v54 = vpop.permute.xlu0 %367 }
 0x5c3   :  { %370 = vst.msk [vmem:[#allocation9 + $0x1] sm:$0x1] %vm266_vm3, %v368_v54  ;;  %1105 = vmatmul.mubr.msk.f32.vlgmr.msra.gmra.mrb[2].mxu1 %vm155_vm2, %v368_v54 }
 0x5c4   :  { %1191 = vmatpush3.bf16.msra.mxu1 %v1476_v8  ;;  %1126 = vmatprep.mubr.msk.f32.mxu1 %vm1388_vm0, %v1389_v1 }
 0x5c5   :  { %1192 = vmatprep.subr.bf16.mxu1 %v1387_v0 }
 0x5c8   :  { %1194 = vmatpush3.bf16.msra.mxu1 %v1479_v11 }
 0x5c9   :  { %1201 = vmatprep.subr.bf16.mxu1 %v1387_v0 }
 0x696   :  { %v440_v56 = vpop.f32.mrb[2].mxu1 }
 0x697   :  { %v444_v57 = vadd.f32 %v440_v56, %v371_v55  ;;  %v1106_v58 = vpop.f32.mrb[3].mxu1 }
 0x699   :  { %1240 = vtanh.f32 %v444_v57  ;;  %v1013_v60 = vmul.f32 -1.442695, %v444_v57 }
 0x69b   :  { %1242 = vpow2.f32 %v1013_v60 }
 0x6a3   :  { %v1241_v59 = vpop.eup %1240 }
 0x6a4   :  { %454 = vrot.lane.b32.xlu1 %v1241_v59, %s1390_s11 }
 0x6a5   :  { %v1243_v61 = vpop.eup %1242 }
 0x6a6   :  { %v448_v62 = vadd.f32 1.0, %v1243_v61 }
 0x6a8   :  { %1244 = vrcp.f32 %v448_v62 }
 0x6b2   :  { %v1245_v63 = vpop.eup %1244 }
 0x6b3   :  { %v452_v4 = vmul.f32 %v1245_v63, %v359_v50 }
 0x716   :  { %v455_v2 = vpop.permute.xlu1 %454 }
 0x717   :  { %v457_v3 = vmul.f32 %v1245_v63, %v455_v2 }
 0x719   :  { %459 = vrot.lane.b32.xlu0 %v457_v3, %s1391_s14 }
 0x78b   :  { %v460_v5 = vpop.permute.xlu0 %459 }
 0x78c   :  { %v462_v6 = vadd.f32 %v460_v5, %v452_v4 }
 0x78e   :  { %1246 = vtanh.f32 %v462_v6 }
 0x798   :  { %v1247_v7 = vpop.eup %1246 }
 0x799   :  { %465 = vrot.lane.b32.xlu1 %v1247_v7, %s1390_s11 }
 0x80b   :  { %v466_v9 = vpop.permute.xlu1 %465 }
 0x80c   :  { %v468_v10 = vmul.f32 %v1245_v63, %v466_v9  ;;  %v783_v63 = vld [vmem:[#allocation2 + $0x6] sm:$0x1] }
 0x80e   :  { %470 = vrot.lane.b32.xlu0 %v468_v10, %s1391_s14 }
 0x880   :  { %v471_v12 = vpop.permute.xlu0 %470 }
 0x881   :  { %473 = vst.msk [vmem:[#allocation9 + $0x2] sm:$0x1] %vm266_vm3, %v471_v12  ;;  %1116 = vmatmul.mubr.msk.f32.vlgmr.msra.gmra.mrb[4].mxu0 %vm155_vm2, %v471_v12 }
 0x882   :  { %1197 = vmatpush3.bf16.msra.mxu0 %v1476_v8  ;;  %1137 = vmatprep.mubr.msk.f32.mxu0 %vm1388_vm0, %v1389_v1 }
 0x883   :  { %1198 = vmatprep.subr.bf16.mxu0 %v1387_v0 }
 0x886   :  { %1200 = vmatpush3.bf16.msra.mxu0 %v1479_v11 }
 0x887   :  { %1207 = vmatprep.subr.bf16.mxu0 %v1387_v0 }
 0x954   :  { %v543_v14 = vpop.f32.mrb[4].mxu0 }
 0x955   :  { %v547_v15 = vadd.f32 %v543_v14, %v474_v13  ;;  %v1117_v16 = vpop.f32.mrb[5].mxu0 }
 0x957   :  { %1248 = vtanh.f32 %v547_v15  ;;  %v1015_v18 = vmul.f32 -1.442695, %v547_v15 }
 0x959   :  { %1250 = vpow2.f32 %v1015_v18 }
 0x961   :  { %v1249_v17 = vpop.eup %1248 }
 0x962   :  { %557 = vrot.lane.b32.xlu1 %v1249_v17, %s1390_s11 }
 0x963   :  { %v1251_v19 = vpop.eup %1250 }
 0x964   :  { %v551_v20 = vadd.f32 1.0, %v1251_v19 }
 0x966   :  { %1252 = vrcp.f32 %v551_v20 }
 0x970   :  { %v1253_v21 = vpop.eup %1252 }
 0x971   :  { %v555_v24 = vmul.f32 %v1253_v21, %v462_v6 }
 0x9d4   :  { %v558_v22 = vpop.permute.xlu1 %557 }
 0x9d5   :  { %v560_v23 = vmul.f32 %v1253_v21, %v558_v22 }
 0x9d7   :  { %562 = vrot.lane.b32.xlu0 %v560_v23, %s1391_s14 }
 0xa49   :  { %v563_v25 = vpop.permute.xlu0 %562 }
 0xa4a   :  { %v565_v26 = vadd.f32 %v563_v25, %v555_v24 }
 0xa4c   :  { %1254 = vtanh.f32 %v565_v26 }
 0xa56   :  { %v1255_v27 = vpop.eup %1254 }
 0xa57   :  { %568 = vrot.lane.b32.xlu1 %v1255_v27, %s1390_s11 }
 0xac9   :  { %v569_v28 = vpop.permute.xlu1 %568 }
 0xaca   :  { %v571_v29 = vmul.f32 %v1253_v21, %v569_v28  ;;  %v886_v21 = vld [vmem:[#allocation2 + $0x7] sm:$0x1] }
 0xacc   :  { %573 = vrot.lane.b32.xlu0 %v571_v29, %s1391_s14 }
 0xb3e   :  { %v574_v30 = vpop.permute.xlu0 %573 }
 0xb3f   :  { %576 = vst.msk [vmem:[#allocation9 + $0x3] sm:$0x1] %vm266_vm3, %v574_v30  ;;  %1127 = vmatmul.mubr.msk.f32.vlgmr.msra.gmra.mrb[4].mxu1 %vm155_vm2, %v574_v30 }
 0xb40   :  { %1203 = vmatpush3.bf16.msra.mxu1 %v1476_v8  ;;  %1148 = vmatprep.mubr.msk.f32.mxu1 %vm1388_vm0, %v1389_v1 }
 0xb41   :  { %1204 = vmatprep.subr.bf16.mxu1 %v1387_v0 }
 0xb44   :  { %1206 = vmatpush3.bf16.msra.mxu1 %v1479_v11 }
 0xc12   :  { %v646_v32 = vpop.f32.mrb[4].mxu1 }
 0xc13   :  { %v650_v33 = vadd.f32 %v646_v32, %v577_v31  ;;  %v1128_v34 = vpop.f32.mrb[5].mxu1 }
 0xc15   :  { %1256 = vtanh.f32 %v650_v33  ;;  %v1017_v36 = vmul.f32 -1.442695, %v650_v33 }
 0xc17   :  { %1258 = vpow2.f32 %v1017_v36 }
 0xc1f   :  { %v1257_v35 = vpop.eup %1256 }
 0xc20   :  { %660 = vrot.lane.b32.xlu1 %v1257_v35, %s1390_s11 }
 0xc21   :  { %v1259_v37 = vpop.eup %1258 }
 0xc22   :  { %v654_v38 = vadd.f32 1.0, %v1259_v37 }
 0xc24   :  { %1260 = vrcp.f32 %v654_v38 }
 0xc2e   :  { %v1261_v39 = vpop.eup %1260 }
 0xc2f   :  { %v658_v42 = vmul.f32 %v1261_v39, %v565_v26 }
 0xc92   :  { %v661_v40 = vpop.permute.xlu1 %660 }
 0xc93   :  { %v663_v41 = vmul.f32 %v1261_v39, %v661_v40 }
 0xc95   :  { %665 = vrot.lane.b32.xlu0 %v663_v41, %s1391_s14 }
 0xd07   :  { %v666_v43 = vpop.permute.xlu0 %665 }
 0xd08   :  { %v668_v44 = vadd.f32 %v666_v43, %v658_v42 }
 0xd0a   :  { %1262 = vtanh.f32 %v668_v44 }
 0xd14   :  { %v1263_v45 = vpop.eup %1262 }
 0xd15   :  { %671 = vrot.lane.b32.xlu1 %v1263_v45, %s1390_s11 }
 0xd87   :  { %v672_v46 = vpop.permute.xlu1 %671 }
 0xd88   :  { %v674_v47 = vmul.f32 %v1261_v39, %v672_v46 }
 0xd8a   :  { %676 = vrot.lane.b32.xlu0 %v674_v47, %s1391_s14 }
 0xdfc   :  { %v677_v48 = vpop.permute.xlu0 %676 }
 0xdfd   :  { %679 = vst.msk [vmem:[#allocation9 + $0x4] sm:$0x1] %vm266_vm3, %v677_v48  ;;  %1138 = vmatmul.mubr.msk.f32.vlgmr.msra.gmra.mrb[6].mxu0 %vm155_vm2, %v677_v48 }
 0xdfe   :  { %1209 = vmatpush3.bf16.msra.mxu0 %v1476_v8  ;;  %1159 = vmatprep.mubr.msk.f32.mxu0 %vm1388_vm0, %v1389_v1 }
 0xdff   :  { %1210 = vmatprep.subr.bf16.mxu0 %v1387_v0 }
 0xe02   :  { %1212 = vmatpush3.bf16.msra.mxu0 %v1479_v11 }
 0xed0   :  { %v749_v50 = vpop.f32.mrb[6].mxu0 }
 0xed1   :  { %v753_v51 = vadd.f32 %v749_v50, %v680_v49  ;;  %v1139_v52 = vpop.f32.mrb[7].mxu0 }
 0xed3   :  { %1264 = vtanh.f32 %v753_v51  ;;  %v1019_v54 = vmul.f32 -1.442695, %v753_v51 }
 0xed5   :  { %1266 = vpow2.f32 %v1019_v54 }
 0xedd   :  { %v1265_v53 = vpop.eup %1264 }
 0xede   :  { %763 = vrot.lane.b32.xlu1 %v1265_v53, %s1390_s11 }
 0xedf   :  { %v1267_v55 = vpop.eup %1266 }
 0xee0   :  { %v757_v56 = vadd.f32 1.0, %v1267_v55 }
 0xee2   :  { %1268 = vrcp.f32 %v757_v56 }
 0xeec   :  { %v1269_v8 = vpop.eup %1268 }
 0xeed   :  { %v761_v0 = vmul.f32 %v1269_v8, %v668_v44 }
 0xf50   :  { %v764_v57 = vpop.permute.xlu1 %763 }
 0xf51   :  { %v766_v1 = vmul.f32 %v1269_v8, %v764_v57 }
 0xf53   :  { %768 = vrot.lane.b32.xlu0 %v766_v1, %s1391_s14 }
 0xfc5   :  { %v769_v11 = vpop.permute.xlu0 %768 }
 0xfc6   :  { %v771_v58 = vadd.f32 %v769_v11, %v761_v0 }
 0xfc8   :  { %1270 = vtanh.f32 %v771_v58 }
 0xfd2   :  { %v1271_v59 = vpop.eup %1270 }
 0xfd3   :  { %774 = vrot.lane.b32.xlu1 %v1271_v59, %s1390_s11 }
0x1045   :  { %v775_v60 = vpop.permute.xlu1 %774 }
0x1046   :  { %v777_v61 = vmul.f32 %v1269_v8, %v775_v60 }
0x1048   :  { %779 = vrot.lane.b32.xlu0 %v777_v61, %s1391_s14 }
0x10ba   :  { %v780_v62 = vpop.permute.xlu0 %779 }
0x10bb   :  { %782 = vst.msk [vmem:[#allocation9 + $0x5] sm:$0x1] %vm266_vm3, %v780_v62  ;;  %1149 = vmatmul.mubr.msk.f32.vlgmr.msra.gmra.mrb[6].mxu1 %vm155_vm2, %v780_v62 }
0x118e   :  { %v852_v2 = vpop.f32.mrb[6].mxu1 }
0x118f   :  { %v856_v3 = vadd.f32 %v852_v2, %v783_v63  ;;  %v1150_v4 = vpop.f32.mrb[7].mxu1 }
0x1191   :  { %1272 = vtanh.f32 %v856_v3  ;;  %v1021_v6 = vmul.f32 -1.442695, %v856_v3 }
0x1193   :  { %1274 = vpow2.f32 %v1021_v6 }
0x119b   :  { %v1273_v5 = vpop.eup %1272 }
0x119c   :  { %866 = vrot.lane.b32.xlu1 %v1273_v5, %s1390_s11 }
0x119d   :  { %v1275_v7 = vpop.eup %1274 }
0x119e   :  { %v860_v9 = vadd.f32 1.0, %v1275_v7 }
0x11a0   :  { %1276 = vrcp.f32 %v860_v9 }
0x11aa   :  { %v1277_v10 = vpop.eup %1276 }
0x11ab   :  { %v864_v14 = vmul.f32 %v1277_v10, %v771_v58 }
0x120e   :  { %v867_v12 = vpop.permute.xlu1 %866 }
0x120f   :  { %v869_v13 = vmul.f32 %v1277_v10, %v867_v12 }
0x1211   :  { %871 = vrot.lane.b32.xlu0 %v869_v13, %s1391_s14 }
0x1283   :  { %v872_v15 = vpop.permute.xlu0 %871 }
0x1284   :  { %v874_v16 = vadd.f32 %v872_v15, %v864_v14 }
0x1286   :  { %1278 = vtanh.f32 %v874_v16 }
0x1290   :  { %v1279_v17 = vpop.eup %1278 }
0x1291   :  { %877 = vrot.lane.b32.xlu1 %v1279_v17, %s1390_s11 }
0x1303   :  { %v878_v18 = vpop.permute.xlu1 %877 }
0x1304   :  { %v880_v19 = vmul.f32 %v1277_v10, %v878_v18 }
0x1306   :  { %882 = vrot.lane.b32.xlu0 %v880_v19, %s1391_s14 }
0x1378   :  { %v883_v20 = vpop.permute.xlu0 %882 }
0x1379   :  { %885 = vst.msk [vmem:[#allocation9 + $0x6] sm:$0x1] %vm266_vm3, %v883_v20  ;;  %1160 = vmatmul.mubr.msk.f32.vlgmr.msra.gmra.mrb[8].mxu0 %vm155_vm2, %v883_v20 }
0x144c   :  { %v955_v22 = vpop.f32.mrb[8].mxu0 }
0x144d   :  { %v959_v23 = vadd.f32 %v955_v22, %v886_v21  ;;  %v1161_v24 = vpop.f32.mrb[9].mxu0 }
0x144f   :  { %1280 = vtanh.f32 %v959_v23  ;;  %v1023_v26 = vmul.f32 -1.442695, %v959_v23 }
0x1451   :  { %1282 = vpow2.f32 %v1023_v26 }
0x1459   :  { %v1281_v25 = vpop.eup %1280 }
0x145a   :  { %969 = vrot.lane.b32.xlu1 %v1281_v25, %s1390_s11 }
0x145b   :  { %v1283_v27 = vpop.eup %1282 }
0x145c   :  { %v963_v28 = vadd.f32 1.0, %v1283_v27 }
0x145e   :  { %1284 = vrcp.f32 %v963_v28 }
0x1468   :  { %v1285_v29 = vpop.eup %1284 }
0x1469   :  { %v967_v32 = vmul.f32 %v1285_v29, %v874_v16 }
0x14cc   :  { %v970_v30 = vpop.permute.xlu1 %969 }
0x14cd   :  { %v972_v31 = vmul.f32 %v1285_v29, %v970_v30 }
0x14cf   :  { %974 = vrot.lane.b32.xlu0 %v972_v31, %s1391_s14 }
0x1541   :  { %v975_v33 = vpop.permute.xlu0 %974 }
0x1542   :  { %v977_v34 = vadd.f32 %v975_v33, %v967_v32 }
0x1544   :  { %1286 = vtanh.f32 %v977_v34 }
0x154e   :  { %v1287_v35 = vpop.eup %1286 }
0x154f   :  { %980 = vrot.lane.b32.xlu1 %v1287_v35, %s1390_s11 }
0x15c1   :  { %v981_v36 = vpop.permute.xlu1 %980 }
0x15c2   :  { %v983_v37 = vmul.f32 %v1285_v29, %v981_v36 }
0x15c4   :  { %985 = vrot.lane.b32.xlu0 %v983_v37, %s1391_s14 }
0x1636   :  { %v986_v38 = vpop.permute.xlu0 %985 }
0x1637   :  { %988 = vst.msk [vmem:[#allocation9 + $0x7] sm:$0x1] %vm266_vm3, %v986_v38 }
0x1638   :  { %1365 = shalt.err (!%p1362_p0)
}
0x1639   :  { %s1366_s18 = scalar_lea.hbm %s1601_s6, 128 }
0x163a   :  { %p1367_p1 = scmp.ne.s32.totalorder %s1601_s6, %s1366_s18  ;;  %p1370_p2 = scmp.lt.u32.totalorder %s1366_s18, %s1601_s6 }
0x163c   :  { %p1372_p3 = pnand %p1370_p2, %p1367_p1 }
0x163e   :  { %1375 = shalt.err (!%p1372_p3)
}
0x163f   :  { %998 = dma.vmem_to_hbm [thread:$0]  %s996_s5, 128, %s1601_s6, [#allocation5]  }
0x1640   :  { %1380 = dma.done.wait [#allocation5], 128  }
0x1641   :  { %1381 = vsyncadd [#allocation5], 4294967168 }
0x1642   :  { %1002 = vsyncpa [#allocation4], 1 }
0x1643   :  { %1003 = vsyncpa [#allocation7], 1 }
0x1644   :  { %1004 = vsyncpa [#allocation5], 1 }

</bundles_post_ra>
